<compile_context>
chip_gen: v7x
topology: tpu7x:2x2x1
jax: 0.10.0
libtpu: 0.0.40
codegen_flags: <defaults>
</compile_context>

<pallas_src>
import functools

import jax
import jax.numpy as jnp
from jax import lax
from jax.experimental import pallas as pl
from jax.experimental.pallas import tpu as pltpu

_EPS = 1e-8  # PyTorch F.cosine_similarity default eps


def _cosine_kernel(a_ref, p_ref, n_ref, out_ref, *, valid_rows, block_rows):
    """One (tb, D) batch tile -> (1, tb, 2) [ap_sim, an_sim] slab."""
    a = a_ref[...].astype(jnp.float32)
    p = p_ref[...].astype(jnp.float32)
    n = n_ref[...].astype(jnp.float32)

    a_ss = jnp.sum(a * a, axis=-1, keepdims=True)   # (tb, 1)
    p_ss = jnp.sum(p * p, axis=-1, keepdims=True)
    n_ss = jnp.sum(n * n, axis=-1, keepdims=True)
    ap = jnp.sum(a * p, axis=-1, keepdims=True)
    an = jnp.sum(a * n, axis=-1, keepdims=True)

    # Stack both pairs once; a single maximum + divide normalizes both.
    # sqrt(ssa) * sqrt(ssb) (instead of rsqrt(ssa*ssb)) cannot overflow f32 and
    # matches PyTorch's dot / max(||a||*||b||, eps) exactly.
    dots = jnp.concatenate([ap, an], axis=1)                    # (tb, 2)
    n_a = jnp.sqrt(a_ss)                                        # (tb, 1)
    n_pn = jnp.sqrt(jnp.concatenate([p_ss, n_ss], axis=1))      # (tb, 2)
    denom = jnp.maximum(n_a * n_pn, jnp.float32(_EPS))
    cos = dots / denom                                          # (tb, 2)

    # Zero padding rows of a partial trailing tile: their VMEM contents are
    # unspecified (could be inf/NaN) and must never leave the kernel.
    row = pl.program_id(0) * block_rows + lax.broadcasted_iota(
        jnp.int32, cos.shape, 0)
    cos = jnp.where(row < valid_rows, cos, 0.0)

    out_ref[0, :, :] = cos.astype(out_ref.dtype)


def _round_up(x, m):
    return ((x + m - 1) // m) * m


def _tpu_params():
    """(per-core VMEM bytes, TensorCores per chip); conservative fallbacks."""
    vmem, cores = 64 << 20, 2  # v7x-like worst case on both axes
    try:
        info = pltpu.get_tpu_info()
        vmem = int(getattr(info, "vmem_capacity_bytes", vmem)) or vmem
        for name in ("num_tensorcores", "tensorcores_per_chip", "num_cores",
                     "core_count"):
            val = getattr(info, name, None)
            if val:
                cores = int(val)
                break
        else:
            cores = 2 if vmem <= (64 << 20) else 1
    except Exception:
        pass
    return vmem, max(1, int(cores))


def _tile_vmem_bytes(tb, d_pad, in_itemsize, out_itemsize, nbuf):
    """Per-step VMEM footprint: lane padding + f32 temporaries included."""
    inputs = 3 * nbuf * tb * d_pad * in_itemsize      # pipelined input buffers
    outputs = 2 * tb * 128 * out_itemsize             # (tb, 2) block pads to 128 lanes
    temps = 6 * tb * d_pad * 4                        # f32 upcasts + live products (VMEM spills)
    return inputs + outputs + temps


def _pick_tile(batch, d, in_itemsize, out_itemsize, vmem_cap, n_cores):
    d_pad = _round_up(d, 128)
    sub = {1: 32, 2: 16}.get(in_itemsize, 8)
    # (1) Bandwidth target: ~2 MiB per input stream per pipeline buffer.
    tb = (2 << 20) // max(d_pad * in_itemsize, 1)
    # (2) VMEM fit under a conservative budget (leave Mosaic scratch + output
    #     buffers plenty of slack, especially on v7x's 64 MiB per core).
    budget = min(44 << 20, max(vmem_cap - (16 << 20), 8 << 20))
    per_row = _tile_vmem_bytes(1, d_pad, in_itemsize, out_itemsize, 2)
    tb = min(tb, budget // max(per_row, 1))
    # (3) Grid-step floor: >= 4 steps per TensorCore so the DMA pipeline (and
    #     both cores on dual-core chips) stays busy.
    tb = min(tb, -(-batch // (4 * n_cores)))
    # (4) Alignment: multiples of 128 keep stores / wrapper slices lane-aligned;
    #     smaller tiles fall back to the dtype sublane multiple.
    if tb >= 128:
        tb = (tb // 128) * 128
    else:
        tb = _round_up(max(tb, 1), sub)
    return int(min(max(tb, sub), _round_up(batch, sub)))


@functools.partial(jax.jit, static_argnames=("block_b",))
def distance_layer(anchor, positive, negative, *, block_b=None):
    """Pallas TPU forward pass of DistanceLayer (cosine sims over dim=-1)."""
    assert anchor.shape == positive.shape == negative.shape
    assert anchor.dtype == positive.dtype == negative.dtype
    *lead, d = anchor.shape
    b = 1
    for s in lead:
        b *= int(s)
    d = int(d)

    out_dtype = anchor.dtype
    in_itemsize = jnp.dtype(anchor.dtype).itemsize
    out_itemsize = jnp.dtype(out_dtype).itemsize
    sub = {1: 32, 2: 16}.get(in_itemsize, 8)

    a2 = anchor.reshape(b, d)
    p2 = positive.reshape(b, d)
    n2 = negative.reshape(b, d)

    # Only pad when the whole batch is below one minimum sublane tile; ragged
    # tails of larger batches use partial trailing blocks (no input copy).
    bk = b
    if b < sub:
        pad = ((0, sub - b), (0, 0))
        a2, p2, n2 = jnp.pad(a2, pad), jnp.pad(p2, pad), jnp.pad(n2, pad)
        bk = sub

    vmem_cap, n_cores = _tpu_params()
    tb = int(block_b) if block_b is not None else _pick_tile(
        bk, d, in_itemsize, out_itemsize, vmem_cap, n_cores)
    nt = pl.cdiv(bk, tb)

    # Small tiles expose per-step DMA latency: go 3-deep on the input buffers.
    nbuf = 3 if (tb <= 64 and nt >= 3) else 2
    in_spec = pl.BlockSpec((tb, d), lambda i: (i, 0))
    if nbuf == 3:
        try:
            in_spec = pl.BlockSpec((tb, d), lambda i: (i, 0),
                                   pipeline_mode=pl.Buffered(3))
        except TypeError:  # BlockSpec without pipeline_mode support
            nbuf = 2
    out_spec = pl.BlockSpec((1, tb, 2), lambda i: (i, 0, 0))

    d_pad = _round_up(d, 128)
    vmem_need = _tile_vmem_bytes(tb, d_pad, in_itemsize, out_itemsize, nbuf)
    vmem_limit = int(max(16 << 20,
                         min(vmem_need + (8 << 20), vmem_cap - (8 << 20))))

    # TODO(synk): for D <= 64, pack k = 128 // D consecutive rows into the lane
    #   axis ((B, D) -> (B//k, k*D), a free row-major reshape) with a segmented
    #   per-group lane reduction; skipped because the segmented reduce needs
    #   either a lane-splitting reshape or MXU passes whose f32 cost rivals the
    #   DMA time — measure before committing.
    # TODO(synk): for very large D (a (sub, D) tile no longer fits the ~44 MiB
    #   v7x budget, D >~ 170K f32), add an "arbitrary" K axis with partial-sum
    #   scratch instead of the single batch axis.
    kernel = functools.partial(_cosine_kernel, valid_rows=b, block_rows=tb)
    out = pl.pallas_call(
        kernel,
        out_shape=jax.ShapeDtypeStruct((nt, tb, 2), out_dtype),
        grid_spec=pltpu.PrefetchScalarGridSpec(
            num_scalar_prefetch=0,
            grid=(nt,),
            in_specs=[in_spec, in_spec, in_spec],
            out_specs=out_spec,
        ),
        compiler_params=pltpu.CompilerParams(
            dimension_semantics=("parallel",),
            vmem_limit_bytes=vmem_limit,
        ),
    )(a2, p2, n2)

    flat = out.reshape(nt * tb, 2)
    ap = flat[:b, 0].reshape(tuple(lead))
    an = flat[:b, 1].reshape(tuple(lead))
    return ap, an


def _ref_cosine(a, b):
    a = a.astype(jnp.float32)
    b = b.astype(jnp.float32)
    dot = jnp.sum(a * b, axis=-1)
    na = jnp.sqrt(jnp.sum(a * a, axis=-1))
    nb = jnp.sqrt(jnp.sum(b * b, axis=-1))
    return dot / jnp.maximum(na * nb, _EPS)


if __name__ == "__main__":
    # Case 1: small embeddings, single tile.
    k1, k2, k3 = jax.random.split(jax.random.PRNGKey(0), 3)
    B, D = 8, 32
    anchor = jax.random.normal(k1, (B, D), dtype=jnp.float32)
    positive = jax.random.normal(k2, (B, D), dtype=jnp.float32)
    negative = jax.random.normal(k3, (B, D), dtype=jnp.float32)

    ap, an = distance_layer(anchor, positive, negative)
    jax.block_until_ready((ap, an))
    assert ap.shape == (B,) and an.shape == (B,)
    assert jnp.allclose(ap, _ref_cosine(anchor, positive), atol=1e-5, rtol=1e-5)
    assert jnp.allclose(an, _ref_cosine(anchor, negative), atol=1e-5, rtol=1e-5)

    # Case 2: ragged batch with leading dims (2, 5) -> partial block + row mask.
    k4, k5, k6 = jax.random.split(jax.random.PRNGKey(1), 3)
    a_r = jax.random.normal(k4, (2, 5, D), dtype=jnp.float32)
    p_r = jax.random.normal(k5, (2, 5, D), dtype=jnp.float32)
    n_r = jax.random.normal(k6, (2, 5, D), dtype=jnp.float32)
    ap_r, an_r = distance_layer(a_r, p_r, n_r)
    jax.block_until_ready((ap_r, an_r))
    assert ap_r.shape == (2, 5) and an_r.shape == (2, 5)
    assert jnp.allclose(ap_r, _ref_cosine(a_r, p_r), atol=1e-5, rtol=1e-5)
    assert jnp.allclose(an_r, _ref_cosine(a_r, n_r), atol=1e-5, rtol=1e-5)

    # Case 3: multi-step grid (>=4 steps/core), non-128 feature dim, partial
    # trailing tile masked in-kernel.
    k7, k8, k9 = jax.random.split(jax.random.PRNGKey(2), 3)
    B2, D2 = 650, 160
    a_m = jax.random.normal(k7, (B2, D2), dtype=jnp.float32)
    p_m = jax.random.normal(k8, (B2, D2), dtype=jnp.float32)
    n_m = jax.random.normal(k9, (B2, D2), dtype=jnp.float32)
    ap_m, an_m = distance_layer(a_m, p_m, n_m)
    jax.block_until_ready((ap_m, an_m))
    assert ap_m.shape == (B2,) and an_m.shape == (B2,)
    assert jnp.allclose(ap_m, _ref_cosine(a_m, p_m), atol=1e-5, rtol=1e-5)
    assert jnp.allclose(an_m, _ref_cosine(a_m, n_m), atol=1e-5, rtol=1e-5)

    print("KERNEL_OK")
</pallas_src>

<mosaic_0001>
module attributes {stable_mosaic.version = 11 : i64} {
  func.func @_cosine_kernel(%arg0: i32, %arg1: memref<8x32xf32, #tpu.memory_space<vmem>>, %arg2: memref<8x32xf32, #tpu.memory_space<vmem>>, %arg3: memref<8x32xf32, #tpu.memory_space<vmem>>, %arg4: memref<1x8x2xf32, #tpu.memory_space<vmem>>) attributes {dimension_semantics = [#tpu.dimension_semantics<parallel>], iteration_bounds = array<i64: 1>, scalar_prefetch = 0 : i64, scratch_operands = 0 : i64, tpu.core_type = #tpu.core_type<tc>, window_params = [{transform_indices = @transform_0, window_bounds = array<i64: 8, 32>}, {transform_indices = @transform_1, window_bounds = array<i64: 8, 32>}, {transform_indices = @transform_2, window_bounds = array<i64: 8, 32>}, {transform_indices = @transform_3, window_bounds = array<i64: 1, 8, 2>}]} {
    %c0 = arith.constant 0 : index
    %c0_0 = arith.constant 0 : index
    %0 = vector.load %arg1[%c0, %c0_0] : memref<8x32xf32, #tpu.memory_space<vmem>>, vector<8x32xf32>
    %c0_1 = arith.constant 0 : index
    %c0_2 = arith.constant 0 : index
    %1 = vector.load %arg2[%c0_1, %c0_2] : memref<8x32xf32, #tpu.memory_space<vmem>>, vector<8x32xf32>
    %c0_3 = arith.constant 0 : index
    %c0_4 = arith.constant 0 : index
    %2 = vector.load %arg3[%c0_3, %c0_4] : memref<8x32xf32, #tpu.memory_space<vmem>>, vector<8x32xf32>
    %3 = arith.mulf %0, %0 : vector<8x32xf32>
    %cst = arith.constant dense<0.000000e+00> : vector<8xf32>
    %4 = vector.multi_reduction <add>, %3, %cst [1] : vector<8x32xf32> to vector<8xf32>
    %5 = vector.shape_cast %4 : vector<8xf32> to vector<8x1xf32>
    %6 = arith.mulf %1, %1 : vector<8x32xf32>
    %cst_5 = arith.constant dense<0.000000e+00> : vector<8xf32>
    %7 = vector.multi_reduction <add>, %6, %cst_5 [1] : vector<8x32xf32> to vector<8xf32>
    %8 = vector.shape_cast %7 : vector<8xf32> to vector<8x1xf32>
    %9 = arith.mulf %2, %2 : vector<8x32xf32>
    %cst_6 = arith.constant dense<0.000000e+00> : vector<8xf32>
    %10 = vector.multi_reduction <add>, %9, %cst_6 [1] : vector<8x32xf32> to vector<8xf32>
    %11 = vector.shape_cast %10 : vector<8xf32> to vector<8x1xf32>
    %12 = arith.mulf %0, %1 : vector<8x32xf32>
    %cst_7 = arith.constant dense<0.000000e+00> : vector<8xf32>
    %13 = vector.multi_reduction <add>, %12, %cst_7 [1] : vector<8x32xf32> to vector<8xf32>
    %14 = vector.shape_cast %13 : vector<8xf32> to vector<8x1xf32>
    %15 = arith.mulf %0, %2 : vector<8x32xf32>
    %cst_8 = arith.constant dense<0.000000e+00> : vector<8xf32>
    %16 = vector.multi_reduction <add>, %15, %cst_8 [1] : vector<8x32xf32> to vector<8xf32>
    %17 = vector.shape_cast %16 : vector<8xf32> to vector<8x1xf32>
    %18 = tpu.concatenate %14, %17 in 1 : vector<8x1xf32>, vector<8x1xf32> -> vector<8x2xf32>
    %19 = math.sqrt %5 : vector<8x1xf32>
    %20 = tpu.concatenate %8, %11 in 1 : vector<8x1xf32>, vector<8x1xf32> -> vector<8x2xf32>
    %21 = math.sqrt %20 : vector<8x2xf32>
    %22 = vector.broadcast %19 : vector<8x1xf32> to vector<8x2xf32>
    %23 = arith.mulf %22, %21 : vector<8x2xf32>
    %cst_9 = arith.constant 9.99999993E-9 : f32
    %24 = vector.broadcast %cst_9 : f32 to vector<8x2xf32>
    %25 = arith.maximumf %23, %24 : vector<8x2xf32>
    %26 = arith.divf %18, %25 : vector<8x2xf32>
    %c8_i32 = arith.constant 8 : i32
    %27 = arith.muli %arg0, %c8_i32 : i32
    %28 = tpu.iota {dimensions = array<i32: 0>} : vector<8x2xi32>
    %29 = vector.broadcast %27 : i32 to vector<8x2xi32>
    %30 = arith.addi %29, %28 : vector<8x2xi32>
    %c8_i32_10 = arith.constant 8 : i32
    %31 = vector.broadcast %c8_i32_10 : i32 to vector<8x2xi32>
    %32 = arith.cmpi slt, %30, %31 : vector<8x2xi32>
    %cst_11 = arith.constant 0.000000e+00 : f32
    %33 = vector.broadcast %cst_11 : f32 to vector<8x2xf32>
    %34 = arith.select %32, %26, %33 : vector<8x2xi1>, vector<8x2xf32>
    %c0_12 = arith.constant 0 : index
    %c0_13 = arith.constant 0 : index
    %c0_14 = arith.constant 0 : index
    %35 = vector.load %arg4[%c0_12, %c0_13, %c0_14] : memref<1x8x2xf32, #tpu.memory_space<vmem>>, vector<1x8x2xf32>
    %36 = vector.shape_cast %35 : vector<1x8x2xf32> to vector<8x2xf32>
    %37 = vector.shape_cast %34 : vector<8x2xf32> to vector<1x8x2xf32>
    tpu.vector_store %arg4[%c0_12, %c0_13, %c0_14], %37 {strides = array<i32>} : memref<1x8x2xf32, #tpu.memory_space<vmem>>, vector<1x8x2xf32>,
    return
  }
  func.func @transform_0(%arg0: i32) -> (i32, i32) {
    %c0_i32 = arith.constant 0 : i32
    %c0_i32_0 = arith.constant 0 : i32
    return %arg0, %c0_i32 : i32, i32
  }
  func.func @transform_1(%arg0: i32) -> (i32, i32) {
    %c0_i32 = arith.constant 0 : i32
    %c0_i32_0 = arith.constant 0 : i32
    return %arg0, %c0_i32 : i32, i32
  }
  func.func @transform_2(%arg0: i32) -> (i32, i32) {
    %c0_i32 = arith.constant 0 : i32
    %c0_i32_0 = arith.constant 0 : i32
    return %arg0, %c0_i32 : i32, i32
  }
  func.func @transform_3(%arg0: i32) -> (i32, i32, i32) {
    %c0_i32 = arith.constant 0 : i32
    %c0_i32_0 = arith.constant 0 : i32
    %c0_i32_1 = arith.constant 0 : i32
    return %arg0, %c0_i32, %c0_i32_0 : i32, i32, i32
  }
}

</mosaic_0001>

<bundles_post_ra>
// kernel: distance_layer.1
= control target key start
LH: loop header
LB: loop body
LE: loop exit
PB: predicated region body
PF: predicated region fallthrough
CT: control target
= control target key end

     0   :  { %8 = vsyncpa [#allocation3], 0  ;;  %s257_s0 = inlined_call_operand.hbm [shape: f32[8,32], index: 0, kind: input, shape index: {}]   ;;  %s258_s1 = inlined_call_operand.hbm [shape: f32[8,32], index: 1, kind: input, shape index: {}]   ;;  %s259_s2 = inlined_call_operand.hbm [shape: f32[8,32], index: 2, kind: input, shape index: {}]   ;;  %s260_s3 = inlined_call_operand.vmem [shape: f32[1,8,2], index: 3, kind: output, shape index: {}]  }
   0x1   :  { %9 = vsyncpa [#allocation5], 0  ;;  %s188_s12 = smov [#allocation4]   ;;  %s189_s14 = smov [#allocation2]  }
   0x2   :  { %s26_s13 = sshll.u32 %s188_s12, 4  ;;  %s16_s15 = sshll.u32 %s189_s14, 4  ;;  %s27_s13 = int_to_ptr.vmem [resolvable:$true] %s26_s13  ;;  %s17_s15 = int_to_ptr.vmem [resolvable:$true] %s16_s15 }
   0x3   :  { %s118_s18 = scalar_lea.hbm %s258_s1, 128 }
   0x4   :  { %p119_p0 = scmp.ne.s32.totalorder %s258_s1, %s118_s18  ;;  %p122_p1 = scmp.lt.u32.totalorder %s118_s18, %s258_s1 }
   0x6   :  { %p124_p2 = pnand %p122_p1, %p119_p0 }
   0x8   :  { %127 = shalt.err (!%p124_p2)
}
   0x9   :  { %s128_s23 = scalar_lea.vmem %s27_s13, 128  ;;  %p133_p4 = scmp.lt.s32.totalorder %s27_s13, %s27_s13 }
   0xa   :  { %p129_p3 = scmp.ne.s32.totalorder %s27_s13, %s128_s23  ;;  %p134_p5 = scmp.lt.s32.totalorder %s128_s23, %s128_s23 }
   0xc   :  { %p135_p6 = por %p134_p5, %p133_p4 }
   0xe   :  { %p136_p7 = pnand %p135_p6, %p129_p3 }
  0x10   :  { %139 = shalt.err (!%p136_p7)
}
  0x11   :  { %29 = dma.hbm_to_vmem [thread:$0]  %s258_s1, 128, %s27_s13, [#allocation5]  }
  0x12   :  { %s140_s28 = scalar_lea.hbm %s257_s0, 128 }
  0x13   :  { %p141_p8 = scmp.ne.s32.totalorder %s257_s0, %s140_s28  ;;  %p144_p9 = scmp.lt.u32.totalorder %s140_s28, %s257_s0 }
  0x15   :  { %p146_p10 = pnand %p144_p9, %p141_p8 }
  0x17   :  { %149 = shalt.err (!%p146_p10)
}
  0x18   :  { %s150_s6 = scalar_lea.vmem %s17_s15, 128  ;;  %p155_p12 = scmp.lt.s32.totalorder %s17_s15, %s17_s15 }
  0x19   :  { %p151_p11 = scmp.ne.s32.totalorder %s17_s15, %s150_s6  ;;  %p156_p13 = scmp.lt.s32.totalorder %s150_s6, %s150_s6 }
  0x1b   :  { %p157_p0 = por %p156_p13, %p155_p12 }
  0x1d   :  { %p158_p1 = pnand %p157_p0, %p151_p11 }
  0x1f   :  { %161 = shalt.err (!%p158_p1)
}
  0x20   :  { %19 = dma.hbm_to_vmem [thread:$0]  %s257_s0, 128, %s17_s15, [#allocation3]  }
  0x21   :  { %s190_s8 = smov [#allocation6]   ;;  %s162_s12 = scalar_lea.hbm %s259_s2, 128 }
  0x22   :  { %s36_s9 = sshll.u32 %s190_s8, 4  ;;  %p163_p2 = scmp.ne.s32.totalorder %s259_s2, %s162_s12  ;;  %s37_s9 = int_to_ptr.vmem [resolvable:$true] %s36_s9 }
  0x23   :  { %p166_p3 = scmp.lt.u32.totalorder %s162_s12, %s259_s2 }
  0x25   :  { %p168_p4 = pnand %p166_p3, %p163_p2 }
  0x27   :  { %171 = shalt.err (!%p168_p4)
}
  0x28   :  { %s172_s18 = scalar_lea.vmem %s37_s9, 128  ;;  %p177_p6 = scmp.lt.s32.totalorder %s37_s9, %s37_s9 }
  0x29   :  { %p173_p5 = scmp.ne.s32.totalorder %s37_s9, %s172_s18  ;;  %p178_p7 = scmp.lt.s32.totalorder %s172_s18, %s172_s18 }
  0x2b   :  { %p179_p8 = por %p178_p7, %p177_p6 }
  0x2d   :  { %p180_p9 = pnand %p179_p8, %p173_p5 }
  0x2f   :  { %183 = shalt.err (!%p180_p9)
}
  0x30   :  { %39 = dma.hbm_to_vmem [thread:$0]  %s259_s2, 128, %s37_s9, [#allocation5]  }
  0x31   :  { %184 = dma.done.wait [#allocation3], 128  }
  0x32   :  { %185 = vsyncadd [#allocation3], 4294967168 }
  0x33   :  { %186 = dma.done.wait [#allocation5], 256  }
  0x34   :  { %187 = vsyncadd [#allocation5], 4294967040  ;;  %v50_v0 = vld [vmem:[#allocation4] sm:$0xff]  ;;  %vm53_vm0 = vcmask 261120   ;;  %v49_v1 = vld [vmem:[#allocation2] sm:$0xff]  ;;  %vm73_vm1 = vcmask 7168  }
  0x35   :  { %v51_v2 = vld [vmem:[#allocation6] sm:$0xff]  ;;  %v57_v3 = vmul.f32 %v50_v0, %v50_v0  ;;  %v52_v4 = vmul.f32 %v49_v1, %v49_v1  ;;  %v65_v6 = vmul.f32 %v50_v0, %v49_v1  ;;  %vm101_vm6 = vcmask 15360  }
  0x36   :  { %v61_v5 = vmul.f32 %v51_v2, %v51_v2  ;;  %v69_v10 = vmul.f32 %v51_v2, %v49_v1 }
  0x37   :  { %v58_v7 = vsel %vm53_vm0, %v57_v3, 0.0  ;;  %v54_v8 = vsel %vm53_vm0, %v52_v4, 0.0  ;;  %v66_v11 = vsel %vm53_vm0, %v65_v6, 0.0 }
  0x38   :  { %59 = vadd.xlane.f32.xlu0 %v58_v7  ;;  %55 = vadd.xlane.f32.xlu1 %v54_v8  ;;  %v62_v9 = vsel %vm53_vm0, %v61_v5, 0.0  ;;  %v70_v12 = vsel %vm53_vm0, %v69_v10, 0.0 }
  0x3c   :  { %63 = vadd.xlane.f32.xlu0 %v62_v9  ;;  %67 = vadd.xlane.f32.xlu1 %v66_v11 }
  0x40   :  { %71 = vadd.xlane.f32.xlu0 %v70_v12 }
  0xc5   :  { %v60_v13 = vpop.xlane.xlu0 %59  ;;  %v56_v14 = vpop.xlane.xlu1 %55 }
  0xc6   :  { %112 = vrsqrt.f32 %v56_v14  ;;  %vm77_vm2 = vcmp.eq.f32.partialorder %v56_v14, inf  ;;  %v80_v22 = vand.u32 2147483648, %v56_v14  ;;  %vm79_vm4 = vcmp.eq.f32.partialorder %v56_v14, 0.0 }
  0xc9   :  { %v64_v15 = vpop.xlane.xlu0 %63  ;;  %v68_v30 = vpop.xlane.xlu1 %67 }
  0xca   :  { %v82_v16 = vsel %vm73_vm1, %v60_v13, %v64_v15 }
  0xcb   :  { %114 = vrsqrt.f32 %v82_v16  ;;  %vm85_vm3 = vcmp.eq.f32.partialorder %v82_v16, inf  ;;  %v88_v23 = vand.u32 2147483648, %v82_v16  ;;  %vm87_vm5 = vcmp.eq.f32.partialorder %v82_v16, 0.0 }
  0xcd   :  { %v72_v29 = vpop.xlane.xlu0 %71 }
  0xce   :  { %v74_v31 = vsel %vm73_vm1, %v68_v30, %v72_v29 }
  0xd0   :  { %v113_v17 = vpop.eup %112 }
  0xd1   :  { %v76_v18 = vmul.f32 %v113_v17, %v56_v14 }
  0xd3   :  { %v78_v20 = vsel %vm77_vm2, %v56_v14, %v76_v18 }
  0xd4   :  { %v81_v25 = vsel %vm79_vm4, %v80_v22, %v78_v20 }
  0xd5   :  { %v115_v19 = vpop.eup %114 }
  0xd6   :  { %v84_v21 = vmul.f32 %v115_v19, %v82_v16 }
  0xd8   :  { %v86_v24 = vsel %vm85_vm3, %v82_v16, %v84_v21 }
  0xd9   :  { %v89_v26 = vsel %vm87_vm5, %v88_v23, %v86_v24 }
  0xda   :  { %v90_v27 = vmul.f32 %v89_v26, %v81_v25 }
  0xdc   :  { %v91_v28 = vmax.f32 %v90_v27, 1e-08 }
  0xde   :  { %116 = vrcp.f32 %v91_v28 }
  0xe8   :  { %v117_v32 = vpop.eup %116 }
  0xe9   :  { %v93_v33 = vmul.f32 %v117_v32, %v74_v31 }
  0xeb   :  { %102 = vst.msk [vmem:[%s260_s3] sm:$0xff] %vm101_vm6, %v93_v33 }
  0xec   :  { %107 = vsyncpa [#allocation3], 1 }
  0xed   :  { %108 = vsyncpa [#allocation5], 1 }

</bundles_post_ra>
